<compile_context>
chip_gen: v7x
topology: tpu7x:2x2x1
jax: 0.10.0
libtpu: 0.0.40
codegen_flags: <defaults>
</compile_context>

<pallas_src>
import jax
import jax.numpy as jnp
from jax.experimental import pallas as pl
from jax.experimental.pallas import tpu as pltpu


# ----------------------------------------------------------------------------
# Kernel: fused twin-MLP, one batch tile per grid step, batch on the lane axis.
# ----------------------------------------------------------------------------
def qnet_kernel(s_ref, a_ref,
                ws1_ref, wa1_ref, b1_ref,
                w2_ref, b2_ref,
                w3_ref, b3_ref,
                out_ref):
    cdt = ws1_ref.dtype  # compute dtype of the MXU operands (f32 or bf16)

    # Layer 1 (fused twin, concat-free): [2H,S]@[S,bt] + [2H,A]@[A,bt], both
    # contracting into the same f32 accumulator -> no [S+A, bt] concat buffer.
    h = jnp.dot(ws1_ref[...], s_ref[...], preferred_element_type=jnp.float32)
    h = h + jnp.dot(wa1_ref[...], a_ref[...], preferred_element_type=jnp.float32)
    h = jnp.maximum(h + b1_ref[...], 0.0)                          # [2H, bt] f32

    # Layer 2: block-diagonal [2H,2H] keeps the two Q branches independent
    # while using a single MXU pass (exactly one 256x256 pass on v6e/v7x).
    h = jnp.dot(w2_ref[...], h.astype(cdt),
                preferred_element_type=jnp.float32) + b2_ref[...]
    h = jnp.maximum(h, 0.0)                                        # [2H, bt] f32

    # Layer 3: block-diagonal [2,2H] -> lane-dense [2, bt] store (q1 row 0,
    # q2 row 1), one unmasked output DMA per tile.
    out_ref[...] = (jnp.dot(w3_ref[...], h.astype(cdt),
                            preferred_element_type=jnp.float32) + b3_ref[...])


# ----------------------------------------------------------------------------
# Parameter init (matches PyTorch weights_init_) and one-time fusion packing.
# ----------------------------------------------------------------------------
def init_qnet_params(key, state_dim, action_dim, hidden_dim=128):
    """xavier_uniform weights, uniform(-0.003, 0.003) biases.
    Weights stored as [in, out] (transposed relative to nn.Linear.weight)."""
    def xavier(key, fan_in, fan_out):
        limit = jnp.sqrt(6.0 / (fan_in + fan_out))
        return jax.random.uniform(key, (fan_in, fan_out), jnp.float32, -limit, limit)

    def bias(key, fan_out):
        return jax.random.uniform(key, (1, fan_out), jnp.float32, -0.003, 0.003)

    D = state_dim + action_dim
    keys = jax.random.split(key, 12)
    return {
        "w11": xavier(keys[0], D, hidden_dim),          "b11": bias(keys[1], hidden_dim),
        "w12": xavier(keys[2], hidden_dim, hidden_dim), "b12": bias(keys[3], hidden_dim),
        "w13": xavier(keys[4], hidden_dim, 1),          "b13": bias(keys[5], 1),
        "w21": xavier(keys[6], D, hidden_dim),          "b21": bias(keys[7], hidden_dim),
        "w22": xavier(keys[8], hidden_dim, hidden_dim), "b22": bias(keys[9], hidden_dim),
        "w23": xavier(keys[10], hidden_dim, 1),         "b23": bias(keys[11], 1),
    }


def pack_qnet_params(params, state_dim, dtype=jnp.float32):
    """One-time packing of the twin branches into fused, *pre-transposed*
    weights (batch-on-lanes layout).  `dtype` controls the MXU operand dtype
    (use jnp.bfloat16 on v6e/v7x for full MXU rate); biases stay f32 since
    they are added to f32 accumulators."""
    S = state_dim
    H = params["w12"].shape[0]
    z_hh = jnp.zeros((H, H), params["w12"].dtype)
    z_h1 = jnp.zeros((H, 1), params["w13"].dtype)

    # Build the fused [in, out] weights first, then transpose once.
    ws1 = jnp.concatenate([params["w11"][:S], params["w21"][:S]], axis=1)   # [S, 2H]
    wa1 = jnp.concatenate([params["w11"][S:], params["w21"][S:]], axis=1)   # [A, 2H]
    b1 = jnp.concatenate([params["b11"], params["b21"]], axis=1)            # [1, 2H]
    w2 = jnp.block([[params["w12"], z_hh], [z_hh, params["w22"]]])          # [2H, 2H]
    b2 = jnp.concatenate([params["b12"], params["b22"]], axis=1)            # [1, 2H]
    w3 = jnp.block([[params["w13"], z_h1], [z_h1, params["w23"]]])          # [2H, 2]
    b3 = jnp.concatenate([params["b13"], params["b23"]], axis=1)            # [1, 2]

    return {
        "ws1": ws1.T.astype(dtype),        # [2H, S]
        "wa1": wa1.T.astype(dtype),        # [2H, A]
        "b1":  b1.T.astype(jnp.float32),   # [2H, 1]
        "w2":  w2.T.astype(dtype),         # [2H, 2H]
        "b2":  b2.T.astype(jnp.float32),   # [2H, 1]
        "w3":  w3.T.astype(dtype),         # [2, 2H]
        "b3":  b3.T.astype(jnp.float32),   # [2, 1]
    }


# ----------------------------------------------------------------------------
# Pallas forward.
# ----------------------------------------------------------------------------
def qnet_forward(state, action, packed, *, b_tile=None):
    """state: [B, S], action: [B, A], packed: pack_qnet_params output
    -> (q1 [B,1], q2 [B,1])."""
    B, S = state.shape
    _, A = action.shape
    H2 = packed["w2"].shape[0]          # 2 * hidden_dim
    cdt = packed["ws1"].dtype           # MXU operand dtype (f32 / bf16)

    # Batch-on-lanes layout: cheap one-time transposes in the wrapper; the
    # kernel then only sees lane-dense tiles.
    s_t = state.T.astype(cdt)           # [S, B]
    a_t = action.T.astype(cdt)          # [A, B]

    # Batch tiling:
    #  * small batches -> single full-array block (one step);
    #  * larger batches -> fat (<=2048), 128-aligned tiles with >= 2 grid
    #    steps so v7x's two TensorCores both get work on the parallel axis.
    if b_tile is None:
        if B <= 256:
            b_tile = B
        else:
            b_tile = min(2048, ((pl.cdiv(B, 2) + 127) // 128) * 128)
    grid = (pl.cdiv(B, b_tile),)

    batch_map = lambda i: (0, i)   # stream batch tiles along lanes
    const_map = lambda i: (0, 0)   # weights/biases stay VMEM-resident (one DMA)

    in_specs = [
        pl.BlockSpec((S, b_tile), batch_map),
        pl.BlockSpec((A, b_tile), batch_map),
        pl.BlockSpec(packed["ws1"].shape, const_map),
        pl.BlockSpec(packed["wa1"].shape, const_map),
        pl.BlockSpec(packed["b1"].shape,  const_map),
        pl.BlockSpec(packed["w2"].shape,  const_map),
        pl.BlockSpec(packed["b2"].shape,  const_map),
        pl.BlockSpec(packed["w3"].shape,  const_map),
        pl.BlockSpec(packed["b3"].shape,  const_map),
    ]
    out_specs = pl.BlockSpec((2, b_tile), batch_map)
    out_shape = jax.ShapeDtypeStruct((2, B), jnp.float32)

    # Advisory cost estimate so XLA can overlap this small custom call with
    # surrounding actor/critic ops.
    D = S + A
    flops = 2 * B * (D * H2 + H2 * H2 + H2 * 2)
    w_bytes = sum(int(v.size) * v.dtype.itemsize for v in packed.values())
    io_bytes = (int(s_t.size) * s_t.dtype.itemsize
                + int(a_t.size) * a_t.dtype.itemsize
                + B * 2 * 4)
    cost = pl.CostEstimate(flops=int(flops), transcendentals=0,
                           bytes_accessed=int(w_bytes + io_bytes))

    out = pl.pallas_call(
        qnet_kernel,
        grid=grid,
        in_specs=in_specs,
        out_specs=out_specs,
        out_shape=out_shape,
        cost_estimate=cost,
        compiler_params=pltpu.CompilerParams(
            dimension_semantics=("parallel",)),  # v7x: shard batch over both TCs
    )(s_t, a_t,
      packed["ws1"], packed["wa1"], packed["b1"],
      packed["w2"], packed["b2"],
      packed["w3"], packed["b3"])

    # [2, B] -> (q1 [B,1], q2 [B,1]) in the wrapper (cheap XLA slice/reshape).
    return out[0].reshape(B, 1), out[1].reshape(B, 1)


# ----------------------------------------------------------------------------
# Pure-JAX reference (unfused, matches the PyTorch module).
# ----------------------------------------------------------------------------
def qnet_reference(state, action, params):
    x = jnp.concatenate([state, action], axis=1)
    h1 = jnp.maximum(x @ params["w11"] + params["b11"], 0.0)
    h1 = jnp.maximum(h1 @ params["w12"] + params["b12"], 0.0)
    q1 = h1 @ params["w13"] + params["b13"]
    h2 = jnp.maximum(x @ params["w21"] + params["b21"], 0.0)
    h2 = jnp.maximum(h2 @ params["w22"] + params["b22"], 0.0)
    q2 = h2 @ params["w23"] + params["b23"]
    return q1, q2


if __name__ == "__main__":
    key = jax.random.PRNGKey(0)
    k_params, k_state, k_action = jax.random.split(key, 3)

    # Small shapes consistent with the module: state_dim=11, action_dim=5,
    # hidden=32, batch=8.
    state_dim, action_dim, hidden_dim, batch = 11, 5, 32, 8

    params = init_qnet_params(k_params, state_dim, action_dim, hidden_dim)
    state = jax.random.normal(k_state, (batch, state_dim), jnp.float32)
    action = jax.random.normal(k_action, (batch, action_dim), jnp.float32)

    q1_ref, q2_ref = qnet_reference(state, action, params)

    # f32 path: bit-accurate-ish vs. the unfused reference.
    packed_f32 = pack_qnet_params(params, state_dim, dtype=jnp.float32)
    q1, q2 = qnet_forward(state, action, packed_f32)
    jax.block_until_ready((q1, q2))
    assert q1.shape == (batch, 1) and q2.shape == (batch, 1)
    assert jnp.allclose(q1, q1_ref, atol=1e-5, rtol=1e-5)
    assert jnp.allclose(q2, q2_ref, atol=1e-5, rtol=1e-5)

    # bf16 operand path (v6e/v7x MXU rate, f32 accumulation): loose tolerance.
    packed_bf16 = pack_qnet_params(params, state_dim, dtype=jnp.bfloat16)
    q1b, q2b = qnet_forward(state, action, packed_bf16)
    jax.block_until_ready((q1b, q2b))
    assert jnp.allclose(q1b, q1_ref, atol=5e-2, rtol=5e-2)
    assert jnp.allclose(q2b, q2_ref, atol=5e-2, rtol=5e-2)

    print("KERNEL_OK")
</pallas_src>

<mosaic_0001>
module attributes {stable_mosaic.version = 11 : i64} {
  func.func @qnet_kernel(%arg0: i32, %arg1: memref<11x8xf32, #tpu.memory_space<vmem>>, %arg2: memref<5x8xf32, #tpu.memory_space<vmem>>, %arg3: memref<64x11xf32, #tpu.memory_space<vmem>>, %arg4: memref<64x5xf32, #tpu.memory_space<vmem>>, %arg5: memref<64x1xf32, #tpu.memory_space<vmem>>, %arg6: memref<64x64xf32, #tpu.memory_space<vmem>>, %arg7: memref<64x1xf32, #tpu.memory_space<vmem>>, %arg8: memref<2x64xf32, #tpu.memory_space<vmem>>, %arg9: memref<2x1xf32, #tpu.memory_space<vmem>>, %arg10: memref<2x8xf32, #tpu.memory_space<vmem>>) attributes {dimension_semantics = [#tpu.dimension_semantics<parallel>], iteration_bounds = array<i64: 1>, scalar_prefetch = 0 : i64, scratch_operands = 0 : i64, tpu.core_type = #tpu.core_type<tc>, window_params = [{transform_indices = @transform_0, window_bounds = array<i64: 11, 8>}, {transform_indices = @transform_1, window_bounds = array<i64: 5, 8>}, {pipeline_mode = #tpu.pipeline_mode<synchronous>, transform_indices = @transform_2, window_bounds = array<i64: 64, 11>}, {pipeline_mode = #tpu.pipeline_mode<synchronous>, transform_indices = @transform_3, window_bounds = array<i64: 64, 5>}, {pipeline_mode = #tpu.pipeline_mode<synchronous>, transform_indices = @transform_4, window_bounds = array<i64: 64, 1>}, {pipeline_mode = #tpu.pipeline_mode<synchronous>, transform_indices = @transform_5, window_bounds = array<i64: 64, 64>}, {pipeline_mode = #tpu.pipeline_mode<synchronous>, transform_indices = @transform_6, window_bounds = array<i64: 64, 1>}, {pipeline_mode = #tpu.pipeline_mode<synchronous>, transform_indices = @transform_7, window_bounds = array<i64: 2, 64>}, {pipeline_mode = #tpu.pipeline_mode<synchronous>, transform_indices = @transform_8, window_bounds = array<i64: 2, 1>}, {transform_indices = @transform_9, window_bounds = array<i64: 2, 8>}]} {
    %c0 = arith.constant 0 : index
    %c0_0 = arith.constant 0 : index
    %0 = vector.load %arg3[%c0, %c0_0] : memref<64x11xf32, #tpu.memory_space<vmem>>, vector<64x11xf32>
    %c0_1 = arith.constant 0 : index
    %c0_2 = arith.constant 0 : index
    %1 = vector.load %arg1[%c0_1, %c0_2] : memref<11x8xf32, #tpu.memory_space<vmem>>, vector<11x8xf32>
    %cst = arith.constant dense<0.000000e+00> : vector<64x8xf32>
    %2 = tpu.matmul %0, %1, %cst {dimension_numbers = #tpu.dot_dimension_numbers<[1], [0], [0], [1], [0, 0, 1, 1], [], []>} : vector<64x11xf32>, vector<11x8xf32>, vector<64x8xf32> -> vector<64x8xf32>
    %c0_3 = arith.constant 0 : index
    %c0_4 = arith.constant 0 : index
    %3 = vector.load %arg4[%c0_3, %c0_4] : memref<64x5xf32, #tpu.memory_space<vmem>>, vector<64x5xf32>
    %c0_5 = arith.constant 0 : index
    %c0_6 = arith.constant 0 : index
    %4 = vector.load %arg2[%c0_5, %c0_6] : memref<5x8xf32, #tpu.memory_space<vmem>>, vector<5x8xf32>
    %cst_7 = arith.constant dense<0.000000e+00> : vector<64x8xf32>
    %5 = tpu.matmul %3, %4, %cst_7 {dimension_numbers = #tpu.dot_dimension_numbers<[1], [0], [0], [1], [0, 0, 1, 1], [], []>} : vector<64x5xf32>, vector<5x8xf32>, vector<64x8xf32> -> vector<64x8xf32>
    %6 = arith.addf %2, %5 : vector<64x8xf32>
    %c0_8 = arith.constant 0 : index
    %c0_9 = arith.constant 0 : index
    %7 = vector.load %arg5[%c0_8, %c0_9] : memref<64x1xf32, #tpu.memory_space<vmem>>, vector<64x1xf32>
    %8 = vector.broadcast %7 : vector<64x1xf32> to vector<64x8xf32>
    %9 = arith.addf %6, %8 : vector<64x8xf32>
    %cst_10 = arith.constant 0.000000e+00 : f32
    %10 = vector.broadcast %cst_10 : f32 to vector<64x8xf32>
    %11 = arith.maximumf %9, %10 : vector<64x8xf32>
    %c0_11 = arith.constant 0 : index
    %c0_12 = arith.constant 0 : index
    %12 = vector.load %arg6[%c0_11, %c0_12] : memref<64x64xf32, #tpu.memory_space<vmem>>, vector<64x64xf32>
    %cst_13 = arith.constant dense<0.000000e+00> : vector<64x8xf32>
    %13 = tpu.matmul %12, %11, %cst_13 {dimension_numbers = #tpu.dot_dimension_numbers<[1], [0], [0], [1], [0, 0, 1, 1], [], []>} : vector<64x64xf32>, vector<64x8xf32>, vector<64x8xf32> -> vector<64x8xf32>
    %c0_14 = arith.constant 0 : index
    %c0_15 = arith.constant 0 : index
    %14 = vector.load %arg7[%c0_14, %c0_15] : memref<64x1xf32, #tpu.memory_space<vmem>>, vector<64x1xf32>
    %15 = vector.broadcast %14 : vector<64x1xf32> to vector<64x8xf32>
    %16 = arith.addf %13, %15 : vector<64x8xf32>
    %cst_16 = arith.constant 0.000000e+00 : f32
    %17 = vector.broadcast %cst_16 : f32 to vector<64x8xf32>
    %18 = arith.maximumf %16, %17 : vector<64x8xf32>
    %c0_17 = arith.constant 0 : index
    %c0_18 = arith.constant 0 : index
    %19 = vector.load %arg8[%c0_17, %c0_18] : memref<2x64xf32, #tpu.memory_space<vmem>>, vector<2x64xf32>
    %cst_19 = arith.constant dense<0.000000e+00> : vector<2x8xf32>
    %20 = tpu.matmul %19, %18, %cst_19 {dimension_numbers = #tpu.dot_dimension_numbers<[1], [0], [0], [1], [0, 0, 1, 1], [], []>} : vector<2x64xf32>, vector<64x8xf32>, vector<2x8xf32> -> vector<2x8xf32>
    %c0_20 = arith.constant 0 : index
    %c0_21 = arith.constant 0 : index
    %21 = vector.load %arg9[%c0_20, %c0_21] : memref<2x1xf32, #tpu.memory_space<vmem>>, vector<2x1xf32>
    %22 = vector.broadcast %21 : vector<2x1xf32> to vector<2x8xf32>
    %23 = arith.addf %20, %22 : vector<2x8xf32>
    %c0_22 = arith.constant 0 : index
    %c0_23 = arith.constant 0 : index
    %24 = vector.load %arg10[%c0_22, %c0_23] : memref<2x8xf32, #tpu.memory_space<vmem>>, vector<2x8xf32>
    tpu.vector_store %arg10[%c0_22, %c0_23], %23 {strides = array<i32>} : memref<2x8xf32, #tpu.memory_space<vmem>>, vector<2x8xf32>,
    return
  }
  func.func @transform_0(%arg0: i32) -> (i32, i32) {
    %c0_i32 = arith.constant 0 : i32
    %c0_i32_0 = arith.constant 0 : i32
    return %c0_i32, %arg0 : i32, i32
  }
  func.func @transform_1(%arg0: i32) -> (i32, i32) {
    %c0_i32 = arith.constant 0 : i32
    %c0_i32_0 = arith.constant 0 : i32
    return %c0_i32, %arg0 : i32, i32
  }
  func.func @transform_2(%arg0: i32) -> (i32, i32) {
    %c0_i32 = arith.constant 0 : i32
    %c0_i32_0 = arith.constant 0 : i32
    %c0_i32_1 = arith.constant 0 : i32
    return %c0_i32, %c0_i32_0 : i32, i32
  }
  func.func @transform_3(%arg0: i32) -> (i32, i32) {
    %c0_i32 = arith.constant 0 : i32
    %c0_i32_0 = arith.constant 0 : i32
    %c0_i32_1 = arith.constant 0 : i32
    return %c0_i32, %c0_i32_0 : i32, i32
  }
  func.func @transform_4(%arg0: i32) -> (i32, i32) {
    %c0_i32 = arith.constant 0 : i32
    %c0_i32_0 = arith.constant 0 : i32
    %c0_i32_1 = arith.constant 0 : i32
    return %c0_i32, %c0_i32_0 : i32, i32
  }
  func.func @transform_5(%arg0: i32) -> (i32, i32) {
    %c0_i32 = arith.constant 0 : i32
    %c0_i32_0 = arith.constant 0 : i32
    %c0_i32_1 = arith.constant 0 : i32
    return %c0_i32, %c0_i32_0 : i32, i32
  }
  func.func @transform_6(%arg0: i32) -> (i32, i32) {
    %c0_i32 = arith.constant 0 : i32
    %c0_i32_0 = arith.constant 0 : i32
    %c0_i32_1 = arith.constant 0 : i32
    return %c0_i32, %c0_i32_0 : i32, i32
  }
  func.func @transform_7(%arg0: i32) -> (i32, i32) {
    %c0_i32 = arith.constant 0 : i32
    %c0_i32_0 = arith.constant 0 : i32
    %c0_i32_1 = arith.constant 0 : i32
    return %c0_i32, %c0_i32_0 : i32, i32
  }
  func.func @transform_8(%arg0: i32) -> (i32, i32) {
    %c0_i32 = arith.constant 0 : i32
    %c0_i32_0 = arith.constant 0 : i32
    %c0_i32_1 = arith.constant 0 : i32
    return %c0_i32, %c0_i32_0 : i32, i32
  }
  func.func @transform_9(%arg0: i32) -> (i32, i32) {
    %c0_i32 = arith.constant 0 : i32
    %c0_i32_0 = arith.constant 0 : i32
    return %c0_i32, %arg0 : i32, i32
  }
}

</mosaic_0001>

<bundles_post_ra>
// kernel: tpu_custom_call.1
= control target key start
LH: loop header
LB: loop body
LE: loop exit
PB: predicated region body
PF: predicated region fallthrough
CT: control target
= control target key end

     0   :  { %vm77_vm0 = vcmask 1044480   ;;  %vm52_vm1 = vcmask 39936   ;;  %vm211_vm2 = vcmask 1042432   ;;  %vm896_vm3 = vmmov 1   ;;  %s1124_s0 = inlined_call_operand.vmem [shape: f32[11,8], index: 0, kind: input, shape index: {}]   ;;  %s1125_s1 = inlined_call_operand.vmem [shape: f32[5,8], index: 1, kind: input, shape index: {}]   ;;  %s1126_s2 = inlined_call_operand.vmem [shape: f32[64,11], index: 2, kind: input, shape index: {}]   ;;  %s1127_s3 = inlined_call_operand.vmem [shape: f32[64,5], index: 3, kind: input, shape index: {}]   ;;  %s1128_s4 = inlined_call_operand.vmem [shape: f32[64,1], index: 4, kind: input, shape index: {}]   ;;  %s1129_s5 = inlined_call_operand.vmem [shape: f32[64,64], index: 5, kind: input, shape index: {}]   ;;  %s1130_s6 = inlined_call_operand.vmem [shape: f32[64,1], index: 6, kind: input, shape index: {}]   ;;  %s1131_s7 = inlined_call_operand.vmem [shape: f32[2,64], index: 7, kind: input, shape index: {}]   ;;  %s1132_s8 = inlined_call_operand.vmem [shape: f32[2,1], index: 8, kind: input, shape index: {}]   ;;  %s1133_s9 = inlined_call_operand.hbm [shape: f32[2,8], index: 9, kind: output, shape index: {}]  }
   0x1   :  { %v51_v0 = vld [vmem:[%s1125_s1] sm:$0x1f]  ;;  %v44_v2 = vld [vmem:[%s1127_s3 + $0x8] sm:$0xff]  ;;  %v45_v5 = vld [vmem:[%s1127_s3 + $0x10] sm:$0xff]  ;;  %v897_v7 = vmov 0  }
   0x2   :  { %v43_v1 = vld [vmem:[%s1127_s3] sm:$0xff]  ;;  %745 = vmatprep.subr.msk.mxu0 %vm77_vm0, %v51_v0  ;;  %v42_v4 = vld [vmem:[%s1124_s0 + $0x8] sm:$0x7]  ;;  %vm823_vm4 = vmpackc.low %vm211_vm2, %vm896_vm3  ;;  %870 = vset.pattern.permute.xlu0 %v897_v7 }
   0x3   :  { %747 = vmatprep.mubr.msk.f32.mxu0 %vm52_vm1, %v43_v1  ;;  %v41_v3 = vld [vmem:[%s1124_s0] sm:$0xff]  ;;  %746 = vmatpush3.msk.msra.mxu0 %vm77_vm0, %v51_v0  ;;  %v46_v8 = vld [vmem:[%s1127_s3 + $0x18] sm:$0xff]  ;;  %v322_v11 = vld [vmem:[%s1128_s4 + $0x10] sm:$0xff] }
   0x4   :  { %v822_v6 = vpack.c.bf16 %v42_v4, %v41_v3  ;;  %748 = vmatmul.mubr.msk.f32.vlgmr.msra.gmra.mrb[0].mxu0 %vm52_vm1, %v44_v2  ;;  %v47_v9 = vld [vmem:[%s1127_s3 + $0x20] sm:$0xff]  ;;  %871 = vset.pattern.permute.xlu1 %v897_v7  ;;  %v48_v12 = vld [vmem:[%s1127_s3 + $0x28] sm:$0xff]  ;;  %v49_v14 = vld [vmem:[%s1127_s3 + $0x30] sm:$0xff] }
   0x5   :  { %750 = vmatprep.mubr.msk.f32.mxu0 %vm52_vm1, %v45_v5  ;;  %v320_v10 = vld [vmem:[%s1128_s4] sm:$0xff]  ;;  %v321_v13 = vld [vmem:[%s1128_s4 + $0x8] sm:$0xff]  ;;  %340 = vperm.xlu1 %871, %v322_v11   ;;  %v323_v15 = vld [vmem:[%s1128_s4 + $0x18] sm:$0xff] }
   0x6   :  { %824 = vmatprep.subr.msk.bf16.mxu0 %vm823_vm4, %v822_v6  ;;  %330 = vperm.xlu0 %870, %v320_v10   ;;  %v50_v16 = vld [vmem:[%s1127_s3 + $0x38] sm:$0xff]  ;;  %v324_v17 = vld [vmem:[%s1128_s4 + $0x20] sm:$0xff] }
   0x7   :  { %827 = vmatpush3.bf16.msk.msra.mxu0 %vm823_vm4, %v822_v6 }
   0x8   :  { %751 = vmatmul.mubr.msk.f32.gmra.mrb[2].mxu0 %vm52_vm1, %v46_v8 }
   0x9   :  { %753 = vmatprep.mubr.msk.f32.mxu0 %vm52_vm1, %v47_v9  ;;  %345 = vperm.xlu1 %871, %v323_v15  }
   0xa   :  { %335 = vperm.xlu0 %870, %v321_v13  }
   0xc   :  { %754 = vmatmul.mubr.msk.f32.gmra.mrb[4].mxu0 %vm52_vm1, %v48_v12 }
   0xd   :  { %756 = vmatprep.mubr.msk.f32.mxu0 %vm52_vm1, %v49_v14 }
   0xe   :  { %14 = vsyncpa [#allocation3], 0  ;;  %v33_v18 = vld [vmem:[%s1126_s2] sm:$0xff]  ;;  %vm186_vm5 = vcmask 89088   ;;  %v325_v19 = vld [vmem:[%s1128_s4 + $0x28] sm:$0xff]  ;;  %350 = vperm.xlu0 %870, %v324_v17   ;;  %vm440_vm6 = vcmask 523264  }
   0xf   :  { %v34_v20 = vld [vmem:[%s1126_s2 + $0x8] sm:$0xff]  ;;  %v326_v21 = vld [vmem:[%s1128_s4 + $0x30] sm:$0xff]  ;;  %355 = vperm.xlu1 %871, %v325_v19   ;;  %v327_v23 = vld [vmem:[%s1128_s4 + $0x38] sm:$0xff]  ;;  %vm899_vm7 = vmmov 0   ;;  %v900_v19 = vmov 0.0   ;;  %s901_s3 = smov [#allocation2]  }
  0x10   :  { %757 = vmatmul.mubr.msk.f32.gmra.mrb[6].mxu0 %vm52_vm1, %v50_v16  ;;  %v35_v22 = vld [vmem:[%s1126_s2 + $0x10] sm:$0xff]  ;;  %v36_v24 = vld [vmem:[%s1126_s2 + $0x18] sm:$0xff]  ;;  %v392_v25 = vld [vmem:[%s1130_s6] sm:$0xff]  ;;  %s666_s21 = sshll.u32 %s901_s3, 4  ;;  %vm658_vm8 = vcmask 58368   ;;  %s667_s21 = int_to_ptr.vmem [resolvable:$true] %s666_s21 }
  0x11   :  { %763 = vmatprep.mubr.msk.f32.mxu0 %vm186_vm5, %v33_v18  ;;  %v37_v26 = vld [vmem:[%s1126_s2 + $0x20] sm:$0xff]  ;;  %v393_v27 = vld [vmem:[%s1130_s6 + $0x8] sm:$0xff]  ;;  %v394_v29 = vld [vmem:[%s1130_s6 + $0x10] sm:$0xff]  ;;  %v898_v18 = vmov 0.0|0.0   ;;  %s872_s0 = scalar_lea.vmem %s667_s21, 32  ;;  %p877_p1 = scmp.lt.s32.totalorder %s667_s21, %s667_s21 }
  0x12   :  { %360 = vperm.xlu0 %870, %v326_v21   ;;  %v38_v28 = vld [vmem:[%s1126_s2 + $0x28] sm:$0xff]  ;;  %v39_v30 = vld [vmem:[%s1126_s2 + $0x30] sm:$0xff]  ;;  %v395_v31 = vld [vmem:[%s1130_s6 + $0x18] sm:$0xff]  ;;  %p873_p0 = scmp.ne.s32.totalorder %s667_s21, %s872_s0  ;;  %p878_p2 = scmp.lt.s32.totalorder %s872_s0, %s872_s0 }
  0x13   :  { %365 = vperm.xlu1 %871, %v327_v23   ;;  %v40_v32 = vld [vmem:[%s1126_s2 + $0x38] sm:$0xff]  ;;  %v396_v33 = vld [vmem:[%s1130_s6 + $0x20] sm:$0xff]  ;;  %v397_v34 = vld [vmem:[%s1130_s6 + $0x28] sm:$0xff] }
  0x14   :  { %764 = vmatmul.mubr.msk.f32.vlgmr.msra.gmra.mrb[0].mxu0 %vm186_vm5, %v34_v20  ;;  %v398_v35 = vld [vmem:[%s1130_s6 + $0x30] sm:$0xff]  ;;  %v399_v36 = vld [vmem:[%s1130_s6 + $0x38] sm:$0xff]  ;;  %v579_v37 = vld [vmem:[%s1132_s8] sm:$0x3]  ;;  %p879_p3 = por %p878_p2, %p877_p1 }
  0x15   :  { %766 = vmatprep.mubr.msk.f32.mxu0 %vm186_vm5, %v35_v22  ;;  %v384_v38 = vld [vmem:[%s1129_s5] sm:$0xff]  ;;  %v385_v11 = vld [vmem:[%s1129_s5 + $0x8] sm:$0xff]  ;;  %v386_v12 = vld [vmem:[%s1129_s5 + $0x10] sm:$0xff] }
  0x16   :  { %402 = vperm.xlu0 %870, %v392_v25   ;;  %791 = vmatprep.mubr.msk.f32.mxu1 %vm440_vm6, %v384_v38  ;;  %v387_v13 = vld [vmem:[%s1129_s5 + $0x18] sm:$0xff]  ;;  %v388_v14 = vld [vmem:[%s1129_s5 + $0x20] sm:$0xff]  ;;  %v389_v15 = vld [vmem:[%s1129_s5 + $0x28] sm:$0xff]  ;;  %p880_p4 = pnand %p879_p3, %p873_p0 }
  0x17   :  { %407 = vperm.xlu1 %871, %v393_v27   ;;  %v390_v16 = vld [vmem:[%s1129_s5 + $0x30] sm:$0xff]  ;;  %v391_v17 = vld [vmem:[%s1129_s5 + $0x38] sm:$0xff] }
  0x18   :  { %767 = vmatmul.mubr.msk.f32.gmra.mrb[2].mxu0 %vm186_vm5, %v36_v24 }
  0x19   :  { %769 = vmatprep.mubr.msk.f32.mxu0 %vm186_vm5, %v37_v26 }
  0x1a   :  { %412 = vperm.xlu0 %870, %v394_v29  }
  0x1b   :  { %417 = vperm.xlu1 %871, %v395_v31  }
  0x1c   :  { %770 = vmatmul.mubr.msk.f32.gmra.mrb[4].mxu0 %vm186_vm5, %v38_v28 }
  0x1d   :  { %772 = vmatprep.mubr.msk.f32.mxu0 %vm186_vm5, %v39_v30 }
  0x1e   :  { %422 = vperm.xlu0 %870, %v396_v33  }
  0x1f   :  { %427 = vperm.xlu1 %871, %v397_v34  }
  0x20   :  { %773 = vmatmul.mubr.msk.f32.gmra.mrb[6].mxu0 %vm186_vm5, %v40_v32 }
  0x22   :  { %432 = vperm.xlu0 %870, %v398_v35  }
  0x23   :  { %437 = vperm.xlu1 %871, %v399_v36  }
  0x26   :  { %582 = vperm.xlu0 %870, %v579_v37  }
  0x84   :  { %v341_v40 = vpop.permute.xlu1 %340 }
  0x85   :  { %v331_v39 = vpop.permute.xlu0 %330 }
  0x88   :  { %v346_v42 = vpop.permute.xlu1 %345 }
  0x89   :  { %v336_v41 = vpop.permute.xlu0 %335 }
  0x8d   :  { %v351_v55 = vpop.permute.xlu0 %350 }
  0x8e   :  { %v356_v52 = vpop.permute.xlu1 %355 }
  0x91   :  { %v361_v3 = vpop.permute.xlu0 %360 }
  0x92   :  { %v366_v0 = vpop.permute.xlu1 %365 }
  0x95   :  { %v403_v21 = vpop.permute.xlu0 %402 }
  0x96   :  { %v408_v20 = vpop.permute.xlu1 %407 }
  0x99   :  { %v413_v24 = vpop.permute.xlu0 %412 }
  0x9a   :  { %v418_v22 = vpop.permute.xlu1 %417 }
  0x9d   :  { %v423_v36 = vpop.permute.xlu0 %422 }
  0x9e   :  { %v428_v33 = vpop.permute.xlu1 %427 }
  0xe7   :  { %v765_v43 = vpop.f32.mrb[0].mxu0 }
  0xe8   :  { %v369_v44 = vadd.f32 %v765_v43, %v336_v41  ;;  %v281_v45 = vpop.f32.mrb[1].mxu0 }
  0xe9   :  { %v368_v46 = vadd.f32 %v331_v39, %v281_v45  ;;  %v438_v45 = vpop.permute.xlu1 %437 }
  0xea   :  { %v377_v47 = vmax.f32 %v369_v44, 0.0 }
  0xeb   :  { %v376_v48 = vmax.f32 %v368_v46, 0.0  ;;  %v768_v49 = vpop.f32.mrb[2].mxu0 }
  0xec   :  { %v371_v50 = vadd.f32 %v768_v49, %v346_v42  ;;  %v291_v51 = vpop.f32.mrb[3].mxu0 }
  0xed   :  { %v370_v53 = vadd.f32 %v341_v40, %v291_v51  ;;  %v828_v54 = vpack.c.bf16 %v377_v47, %v376_v48  ;;  %v433_v48 = vpop.permute.xlu0 %432 }
  0xee   :  { %v379_v56 = vmax.f32 %v371_v50, 0.0 }
  0xef   :  { %v378_v57 = vmax.f32 %v370_v53, 0.0  ;;  %v771_v58 = vpop.f32.mrb[4].mxu0  ;;  %829 = vmatprep.subr.bf16.mxu1 %v828_v54 }
  0xf0   :  { %v373_v59 = vadd.f32 %v771_v58, %v356_v52  ;;  %v301_v60 = vpop.f32.mrb[5].mxu0  ;;  %831 = vmatpush3.bf16.msra.mxu1 %v828_v54 }
  0xf1   :  { %v832_v61 = vpack.c.bf16 %v379_v56, %v378_v57  ;;  %v372_v62 = vadd.f32 %v351_v55, %v301_v60  ;;  %v578_v56 = vld [vmem:[%s1131_s7] sm:$0x3]  ;;  %v583_v57 = vpop.permute.xlu0 %582 }
  0xf2   :  { %v381_v63 = vmax.f32 %v373_v59, 0.0 }
  0xf3   :  { %v380_v1 = vmax.f32 %v372_v62, 0.0  ;;  %v774_v2 = vpop.f32.mrb[6].mxu0  ;;  %833 = vmatprep.subr.bf16.mxu1 %v832_v61 }
  0xf4   :  { %v375_v4 = vadd.f32 %v774_v2, %v366_v0  ;;  %v311_v5 = vpop.f32.mrb[7].mxu0  ;;  %835 = vmatpush3.bf16.msra.mxu1 %v832_v61 }
  0xf5   :  { %v836_v6 = vpack.c.bf16 %v381_v63, %v380_v1  ;;  %v374_v7 = vadd.f32 %v361_v3, %v311_v5 }
  0xf6   :  { %v383_v8 = vmax.f32 %v375_v4, 0.0 }
  0xf7   :  { %v382_v9 = vmax.f32 %v374_v7, 0.0  ;;  %837 = vmatprep.subr.bf16.mxu1 %v836_v6 }
  0xf8   :  { %839 = vmatpush3.bf16.msra.mxu1 %v836_v6 }
  0xf9   :  { %v840_v10 = vpack.c.bf16 %v383_v8, %v382_v9 }
  0xfb   :  { %841 = vmatprep.subr.bf16.mxu1 %v840_v10 }
  0xfc   :  { %843 = vmatpush3.bf16.msra.mxu1 %v840_v10 }
  0xfd   :  { %844 = vmatprep.subr.bf16.mxu1 %v898_v18 }
  0xff   :  { %792 = vmatmul.mubr.msk.f32.vlgmr.msra.gmra.mrb[0].mxu1 %vm440_vm6, %v385_v11 }
 0x100   :  { %794 = vmatprep.mubr.msk.f32.mxu1 %vm440_vm6, %v386_v12 }
 0x103   :  { %795 = vmatmul.mubr.msk.f32.gmra.mrb[2].mxu1 %vm440_vm6, %v387_v13 }
 0x104   :  { %797 = vmatprep.mubr.msk.f32.mxu1 %vm440_vm6, %v388_v14 }
 0x107   :  { %798 = vmatmul.mubr.msk.f32.gmra.mrb[4].mxu1 %vm440_vm6, %v389_v15 }
 0x108   :  { %800 = vmatprep.mubr.msk.f32.mxu1 %vm440_vm6, %v390_v16 }
 0x10b   :  { %801 = vmatmul.mubr.msk.f32.gmra.mrb[6].mxu1 %vm440_vm6, %v391_v17 }
 0x10c   :  { %819 = vmatprep.mubr.msk.f32.mxu1 %vm899_vm7, %v900_v19 }
 0x1d2   :  { %v793_v23 = vpop.f32.mrb[0].mxu1 }
 0x1d3   :  { %v537_v25 = vadd.f32 %v793_v23, %v408_v20  ;;  %v531_v26 = vpop.f32.mrb[1].mxu1 }
 0x1d4   :  { %v532_v27 = vadd.f32 %v531_v26, %v403_v21 }
 0x1d5   :  { %v571_v28 = vmax.f32 %v537_v25, 0.0 }
 0x1d6   :  { %v570_v29 = vmax.f32 %v532_v27, 0.0  ;;  %v796_v30 = vpop.f32.mrb[2].mxu1 }
 0x1d7   :  { %v547_v31 = vadd.f32 %v796_v30, %v418_v22  ;;  %v541_v32 = vpop.f32.mrb[3].mxu1 }
 0x1d8   :  { %v845_v34 = vpack.c.bf16 %v571_v28, %v570_v29  ;;  %v542_v35 = vadd.f32 %v541_v32, %v413_v24 }
 0x1d9   :  { %v573_v37 = vmax.f32 %v547_v31, 0.0 }
 0x1da   :  { %v572_v38 = vmax.f32 %v542_v35, 0.0  ;;  %v799_v39 = vpop.f32.mrb[4].mxu1  ;;  %846 = vmatpush3.bf16.msra.mxu1 %v845_v34 }
 0x1db   :  { %v557_v40 = vadd.f32 %v799_v39, %v428_v33  ;;  %v551_v41 = vpop.f32.mrb[5].mxu1  ;;  %847 = vmatprep.subr.bf16.mxu1 %v898_v18 }
 0x1dc   :  { %v848_v42 = vpack.c.bf16 %v573_v37, %v572_v38  ;;  %v552_v43 = vadd.f32 %v551_v41, %v423_v36 }
 0x1dd   :  { %v575_v44 = vmax.f32 %v557_v40, 0.0 }
 0x1de   :  { %v574_v46 = vmax.f32 %v552_v43, 0.0  ;;  %v802_v47 = vpop.f32.mrb[6].mxu1  ;;  %849 = vmatpush3.bf16.msra.mxu1 %v848_v42 }
 0x1df   :  { %v567_v49 = vadd.f32 %v802_v47, %v438_v45  ;;  %v561_v50 = vpop.f32.mrb[7].mxu1  ;;  %850 = vmatprep.subr.bf16.mxu1 %v898_v18 }
 0x1e0   :  { %v851_v51 = vpack.c.bf16 %v575_v44, %v574_v46  ;;  %v562_v52 = vadd.f32 %v561_v50, %v433_v48 }
 0x1e1   :  { %v577_v53 = vmax.f32 %v567_v49, 0.0 }
 0x1e2   :  { %v576_v54 = vmax.f32 %v562_v52, 0.0  ;;  %852 = vmatpush3.bf16.msra.mxu1 %v851_v51 }
 0x1e3   :  { %853 = vmatprep.subr.bf16.mxu1 %v898_v18 }
 0x1e4   :  { %v854_v55 = vpack.c.bf16 %v577_v53, %v576_v54 }
 0x1e6   :  { %855 = vmatpush3.bf16.msra.mxu1 %v854_v55 }
 0x1e9   :  { %820 = vmatmul.mubr.msk.f32.vlgmr.msra.gmra.mrb[8].mxu1 %vm440_vm6, %v578_v56 }
 0x2bc   :  { %v654_v58 = vpop.f32.mrb[8].mxu1 }
 0x2bd   :  { %v655_v59 = vadd.f32 %v654_v58, %v583_v57  ;;  %v821_v60 = vpop.f32.mrb[9].mxu1 }
 0x2bf   :  { %659 = vst.msk [vmem:[#allocation2] sm:$0x3] %vm658_vm8, %v655_v59 }
 0x2c0   :  { %883 = shalt.err (!%p880_p4)
}
 0x2c1   :  { %s884_s23 = scalar_lea.hbm %s1133_s9, 32 }
 0x2c2   :  { %p885_p5 = scmp.ne.s32.totalorder %s1133_s9, %s884_s23  ;;  %p888_p6 = scmp.lt.u32.totalorder %s884_s23, %s1133_s9 }
 0x2c4   :  { %p890_p7 = pnand %p888_p6, %p885_p5 }
 0x2c6   :  { %893 = shalt.err (!%p890_p7)
}
 0x2c7   :  { %669 = dma.vmem_to_hbm [thread:$0]  %s667_s21, 32, %s1133_s9, [#allocation3]  }
 0x2c8   :  { %894 = dma.done.wait [#allocation3], 32  }
 0x2c9   :  { %895 = vsyncadd [#allocation3], 4294967264 }
 0x2ca   :  { %673 = vsyncpa [#allocation3], 1 }

</bundles_post_ra>
